<compile_context>
chip_gen: v5e
topology: v5e:2x2
jax: 0.10.0
libtpu: 0.0.40
codegen_flags: <defaults>
</compile_context>

<pallas_src>
import jax
import jax.numpy as jnp
import numpy as np
from jax import lax
from jax.experimental import pallas as pl
from jax.experimental.pallas import tpu as pltpu

PAD_ID = 0
BOS_ID = 1
EOS_ID = 2
VOCAB_SIZE = 30522
MAX_LENGTH = 16      # self.max_length of the module (small, per instructions)
RAW_LEN = 24         # pre-truncation token buffer length (>= MAX_LENGTH)
BATCH_PAD = 128      # batch padding granularity (sublane-friendly, >= 8)


# ----------------------------------------------------------------------------
# Pallas kernel: truncate / pad / build attention mask, batch-major.
# ----------------------------------------------------------------------------
def _pad_trunc_kernel(ids_ref, lens_ref, ids_out_ref, mask_ref):
    # ids_ref:     [TB, RAW_LEN]     int32  (raw token buffer, junk past lens)
    # lens_ref:    [TB, 1]           int32  (true token count per example)
    # ids_out_ref: [TB, MAX_LENGTH]  int32  (module layout -- no post-kernel transpose)
    # mask_ref:    [TB, MAX_LENGTH]  int8
    max_len = ids_out_ref.shape[-1]
    ids = ids_ref[...][:, :max_len]                   # truncation=True (in-vreg slice)
    lens = lens_ref[...]                              # (TB, 1)
    pos = lax.broadcasted_iota(jnp.int32, ids.shape, dimension=1)
    valid = pos < lens                                # padding='max_length' mask
    ids_out_ref[...] = jnp.where(valid, ids, jnp.int32(PAD_ID))
    mask_ref[...] = jnp.where(valid, 1, 0).astype(mask_ref.dtype)


def _pick_batch_tile(b_pad: int) -> int:
    # Small batches: one block => pay the per-grid-step overhead exactly once.
    # Large batches: tiles <= 2048 => >=2 "parallel" steps (v7x megacore) and
    # large contiguous DMAs; working set stays well under VMEM on all chips.
    if b_pad <= 2048:
        return b_pad
    for t in (2048, 1024, 512, 256, 128):
        if b_pad % t == 0:
            return t
    return 128


def txt_tokenizer_pad_kernel(raw_ids, lens, batch, max_length=MAX_LENGTH):
    """raw_ids: [B_pad, RAW_LEN] int32 (batch-major), lens: [B_pad, 1] int32.

    Returns a dict like BatchEncoding with
      input_ids:      (batch, max_length) int32
      attention_mask: (batch, max_length) int8   (0/1 values; widen downstream)
    """
    b_pad, raw_len = raw_ids.shape
    assert raw_len >= max_length
    assert lens.shape == (b_pad, 1)
    assert b_pad % 8 == 0

    batch_tile = _pick_batch_tile(b_pad)
    grid = (b_pad // batch_tile,)

    ids_out, mask_out = pl.pallas_call(
        _pad_trunc_kernel,
        out_shape=(jax.ShapeDtypeStruct((b_pad, max_length), jnp.int32),
                   jax.ShapeDtypeStruct((b_pad, max_length), jnp.int8)),
        grid=grid,
        in_specs=[
            pl.BlockSpec((batch_tile, raw_len), lambda j: (j, 0)),
            pl.BlockSpec((batch_tile, 1), lambda j: (j, 0)),
        ],
        out_specs=(
            pl.BlockSpec((batch_tile, max_length), lambda j: (j, 0)),
            pl.BlockSpec((batch_tile, max_length), lambda j: (j, 0)),
        ),
        compiler_params=pltpu.CompilerParams(
            dimension_semantics=("parallel",)),   # pipelined + megacore on v7x
    )(raw_ids, lens)

    # Only a trivial row slice back to the true batch; the outputs are already
    # in the module's (B, max_length) layout (no XLA transpose pass).
    return {"input_ids": ids_out[:batch],
            "attention_mask": mask_out[:batch]}


# ----------------------------------------------------------------------------
# Deterministic host-side "tokenizer" glue (string -> batch-major raw ids).
# TODO(synk): real HuggingFace subword tokenization is host-side string
#             processing with no Pallas equivalent; a deterministic hash
#             tokenizer stands in for it.
# ----------------------------------------------------------------------------
def _simple_word_ids(text: str):
    ids = [BOS_ID]
    for w in text.lower().split():
        h = 0
        for c in w:
            h = (h * 31 + ord(c)) % (VOCAB_SIZE - 3)
        ids.append(h + 3)
    ids.append(EOS_ID)
    return ids


def get_num_required_tokens(text: str) -> int:
    """Mirror of TxtTokenizer.get_num_required_tokens (untruncated length)."""
    assert isinstance(text, str)
    return len(_simple_word_ids(text))


def tokenize_texts(texts, key, max_length=MAX_LENGTH, raw_len=RAW_LEN,
                   pad_to=BATCH_PAD):
    """List[str] -> ([B_pad, RAW_LEN] ids, [B_pad, 1] lengths, true batch).

    The buffer is junk-filled beyond each example's true length and beyond the
    true batch; the kernel must mask all of it.  For over-length sequences the
    final EOS special token is re-placed at position max_length-1 (HF-style
    truncation keeps the closing special token).
    """
    B = len(texts)
    b_pad = max(pad_to, ((B + pad_to - 1) // pad_to) * pad_to)
    filler = jax.random.randint(key, (b_pad, raw_len), 3, VOCAB_SIZE,
                                dtype=jnp.int32)
    raw = np.asarray(jax.device_get(filler)).copy()
    lens = np.zeros((b_pad, 1), dtype=np.int32)
    for b, t in enumerate(texts):
        ids = _simple_word_ids(t)
        n = len(ids)
        lens[b, 0] = n
        if n > max_length:
            ids = ids[:max_length - 1] + [EOS_ID]     # keep EOS like HF truncation
        raw[b, :len(ids)] = np.asarray(ids, dtype=np.int32)
    return jnp.asarray(raw), jnp.asarray(lens), B


# ----------------------------------------------------------------------------
# Pure-JAX reference for verification
# ----------------------------------------------------------------------------
def _reference(raw_ids, lens, batch, max_length=MAX_LENGTH):
    ids = raw_ids[:batch, :max_length]
    pos = jnp.arange(max_length, dtype=jnp.int32)[None, :]
    valid = pos < lens[:batch]                           # (B,1) broadcast -> (B,L)
    return (jnp.where(valid, ids, PAD_ID).astype(jnp.int32),
            valid.astype(jnp.int32))


if __name__ == "__main__":
    key = jax.random.PRNGKey(0)
    texts = [
        "a red chair near the window with a small wooden table and a lamp on top of it",
        "two lamps",
    ]
    raw_ids, lens, B = tokenize_texts(texts, key)        # (128, 24), (128, 1), B=2

    out = txt_tokenizer_pad_kernel(raw_ids, lens, B, MAX_LENGTH)
    jax.block_until_ready(out["input_ids"])
    jax.block_until_ready(out["attention_mask"])

    ref_ids, ref_mask = _reference(raw_ids, lens, B, MAX_LENGTH)
    assert out["input_ids"].shape == (B, MAX_LENGTH)
    assert out["attention_mask"].shape == (B, MAX_LENGTH)
    assert out["input_ids"].dtype == jnp.int32
    assert bool(jnp.all(out["input_ids"] == ref_ids))
    assert bool(jnp.all(out["attention_mask"].astype(jnp.int32) == ref_mask))

    print("KERNEL_OK")
</pallas_src>

<mosaic_0001>
module attributes {stable_mosaic.version = 11 : i64} {
  func.func @_pad_trunc_kernel(%arg0: i32, %arg1: memref<128x24xi32, #tpu.memory_space<vmem>>, %arg2: memref<128x1xi32, #tpu.memory_space<vmem>>, %arg3: memref<128x16xi32, #tpu.memory_space<vmem>>, %arg4: memref<128x16xi8, #tpu.memory_space<vmem>>) attributes {dimension_semantics = [#tpu.dimension_semantics<parallel>], iteration_bounds = array<i64: 1>, scalar_prefetch = 0 : i64, scratch_operands = 0 : i64, tpu.core_type = #tpu.core_type<tc>, window_params = [{transform_indices = @transform_0, window_bounds = array<i64: 128, 24>}, {transform_indices = @transform_1, window_bounds = array<i64: 128, 1>}, {transform_indices = @transform_2, window_bounds = array<i64: 128, 16>}, {transform_indices = @transform_3, window_bounds = array<i64: 128, 16>}]} {
    %c0 = arith.constant 0 : index
    %c0_0 = arith.constant 0 : index
    %0 = vector.load %arg1[%c0, %c0_0] : memref<128x24xi32, #tpu.memory_space<vmem>>, vector<128x24xi32>
    %1 = vector.extract_strided_slice %0 {offsets = [0, 0], sizes = [128, 16], strides = [1, 1]} : vector<128x24xi32> to vector<128x16xi32>
    %c0_1 = arith.constant 0 : index
    %c0_2 = arith.constant 0 : index
    %2 = vector.load %arg2[%c0_1, %c0_2] : memref<128x1xi32, #tpu.memory_space<vmem>>, vector<128x1xi32>
    %3 = tpu.iota {dimensions = array<i32: 1>} : vector<128x16xi32>
    %4 = vector.broadcast %2 : vector<128x1xi32> to vector<128x16xi32>
    %5 = arith.cmpi slt, %3, %4 : vector<128x16xi32>
    %c0_i32 = arith.constant 0 : i32
    %6 = vector.broadcast %c0_i32 : i32 to vector<128x16xi32>
    %7 = arith.select %5, %1, %6 : vector<128x16xi1>, vector<128x16xi32>
    %c0_3 = arith.constant 0 : index
    %c0_4 = arith.constant 0 : index
    %8 = vector.load %arg3[%c0_3, %c0_4] : memref<128x16xi32, #tpu.memory_space<vmem>>, vector<128x16xi32>
    tpu.vector_store %arg3[%c0_3, %c0_4], %7 {strides = array<i32>} : memref<128x16xi32, #tpu.memory_space<vmem>>, vector<128x16xi32>,
    %c1_i32 = arith.constant 1 : i32
    %c0_i32_5 = arith.constant 0 : i32
    %9 = vector.broadcast %c1_i32 : i32 to vector<128x16xi32>
    %10 = vector.broadcast %c0_i32_5 : i32 to vector<128x16xi32>
    %11 = arith.select %5, %9, %10 : vector<128x16xi1>, vector<128x16xi32>
    %12 = arith.trunci %11 : vector<128x16xi32> to vector<128x16xi8>
    %c0_6 = arith.constant 0 : index
    %c0_7 = arith.constant 0 : index
    %13 = vector.load %arg4[%c0_6, %c0_7] : memref<128x16xi8, #tpu.memory_space<vmem>>, vector<128x16xi8>
    tpu.vector_store %arg4[%c0_6, %c0_7], %12 {strides = array<i32>} : memref<128x16xi8, #tpu.memory_space<vmem>>, vector<128x16xi8>,
    return
  }
  func.func @transform_0(%arg0: i32) -> (i32, i32) {
    %c0_i32 = arith.constant 0 : i32
    %c0_i32_0 = arith.constant 0 : i32
    return %arg0, %c0_i32 : i32, i32
  }
  func.func @transform_1(%arg0: i32) -> (i32, i32) {
    %c0_i32 = arith.constant 0 : i32
    %c0_i32_0 = arith.constant 0 : i32
    return %arg0, %c0_i32 : i32, i32
  }
  func.func @transform_2(%arg0: i32) -> (i32, i32) {
    %c0_i32 = arith.constant 0 : i32
    %c0_i32_0 = arith.constant 0 : i32
    return %arg0, %c0_i32 : i32, i32
  }
  func.func @transform_3(%arg0: i32) -> (i32, i32) {
    %c0_i32 = arith.constant 0 : i32
    %c0_i32_0 = arith.constant 0 : i32
    return %arg0, %c0_i32 : i32, i32
  }
}

</mosaic_0001>

<bundles_post_ra>
// kernel: tpu_custom_call.1
= control target key start
LH: loop header
LB: loop body
LE: loop exit
PB: predicated region body
PF: predicated region fallthrough
CT: control target
= control target key end

     0   :  { %v221_v0 = vmov 0   ;;  %v45_v17 = vlaneseq  ;;  %vm127_vm1 = vcmask 130048   ;;  %vm192_vm2 = vcmask 123904   ;;  %s503_s1 = inlined_call_operand.vmem [shape: s32[128,1], index: 1, kind: input, shape index: {}]   ;;  %s504_s0 = inlined_call_operand.vmem [shape: s32[128,24], index: 0, kind: input, shape index: {}]   ;;  %s505_s2 = inlined_call_operand.vmem [shape: s32[128,16], index: 2, kind: output, shape index: {0}]   ;;  %s506_s3 = inlined_call_operand.vmem [shape: s8[128,16], index: 3, kind: output, shape index: {1}]  }
   0x1   :  { %220 = vset.pattern.permute.xlu2 %v221_v0  ;;  %219 = vset.pattern.permute.xlu1 %v221_v0  ;;  %v33_v1 = vld [vmem:[%s503_s1 + $0x20] sm:$0xff]  ;;  %v31_v2 = vld [vmem:[%s503_s1 + $0x10] sm:$0xff]  ;;  %v34_v4 = vld [vmem:[%s503_s1 + $0x28] sm:$0xff] }
   0x2   :  { %v29_v3 = vld [vmem:[%s503_s1] sm:$0xff]  ;;  %218 = vset.pattern.permute.xlu0 %v221_v0  ;;  %60 = vperm.xlu2 %220, %v33_v1   ;;  %v32_v5 = vld [vmem:[%s503_s1 + $0x18] sm:$0xff]  ;;  %v30_v6 = vld [vmem:[%s503_s1 + $0x8] sm:$0xff]  ;;  %v293_v18 = vand.u32 127, %v45_v17 }
   0x3   :  { %54 = vperm.xlu1 %219, %v31_v2   ;;  %48 = vperm.xlu0 %218, %v29_v3   ;;  %v37_v7 = vld [vmem:[%s503_s1 + $0x40] sm:$0xff]  ;;  %v36_v8 = vld [vmem:[%s503_s1 + $0x38] sm:$0xff]  ;;  %v35_v9 = vld [vmem:[%s503_s1 + $0x30] sm:$0xff] }
   0x4   :  { %v40_v10 = vld [vmem:[%s503_s1 + $0x58] sm:$0xff]  ;;  %v39_v11 = vld [vmem:[%s503_s1 + $0x50] sm:$0xff]  ;;  %v38_v12 = vld [vmem:[%s503_s1 + $0x48] sm:$0xff] }
   0x5   :  { %v43_v13 = vld [vmem:[%s503_s1 + $0x70] sm:$0xff]  ;;  %v42_v14 = vld [vmem:[%s503_s1 + $0x68] sm:$0xff]  ;;  %v41_v15 = vld [vmem:[%s503_s1 + $0x60] sm:$0xff] }
   0x6   :  { %v44_v16 = vld [vmem:[%s503_s1 + $0x78] sm:$0xff]  ;;  %v17_v19 = vld [vmem:[%s504_s0 + $0x20] sm:$0xff]  ;;  %v18_v25 = vld [vmem:[%s504_s0 + $0x28] sm:$0xff] }
   0x7   :  { %v21_v31 = vld [vmem:[%s504_s0 + $0x40] sm:$0xff]  ;;  %v24_v37 = vld [vmem:[%s504_s0 + $0x58] sm:$0xff]  ;;  %v15_v39 = vld [vmem:[%s504_s0 + $0x10] sm:$0xff] }
   0x8   :  { %v13_v40 = vld [vmem:[%s504_s0] sm:$0xff]  ;;  %v27_v55 = vld [vmem:[%s504_s0 + $0x70] sm:$0xff]  ;;  %v16_v57 = vld [vmem:[%s504_s0 + $0x18] sm:$0xff] }
   0x9   :  { %v14_v58 = vld [vmem:[%s504_s0 + $0x8] sm:$0xff] }
   0xa   :  { %63 = vperm.xlu2 %220, %v34_v4  }
   0xb   :  { %57 = vperm.xlu1 %219, %v32_v5   ;;  %51 = vperm.xlu0 %218, %v30_v6  }
  0x12   :  { %72 = vperm.xlu2 %220, %v37_v7  }
  0x13   :  { %69 = vperm.xlu1 %219, %v36_v8   ;;  %66 = vperm.xlu0 %218, %v35_v9  }
  0x1a   :  { %81 = vperm.xlu2 %220, %v40_v10   ;;  %v20_v10 = vld [vmem:[%s504_s0 + $0x38] sm:$0xff] }
  0x1b   :  { %78 = vperm.xlu1 %219, %v39_v11   ;;  %75 = vperm.xlu0 %218, %v38_v12   ;;  %v19_v11 = vld [vmem:[%s504_s0 + $0x30] sm:$0xff] }
  0x22   :  { %90 = vperm.xlu2 %220, %v43_v13  }
  0x23   :  { %87 = vperm.xlu1 %219, %v42_v14   ;;  %84 = vperm.xlu0 %218, %v41_v15  }
  0x2b   :  { %93 = vperm.xlu0 %218, %v44_v16  }
  0x5c   :  { %v61_v20 = vpop.permute.xlu2 %60 }
  0x5d   :  { %vm99_vm0 = vcmp.lt.s32.totalorder %v293_v18, %v61_v20 }
  0x5e   :  { %v115_v21 = vsel %vm99_vm0, %v17_v19, 0  ;;  %v148_v22 = vsel %vm99_vm0, 1, %v221_v0 }
  0x5f   :  { %132 = vst.msk [vmem:[%s505_s2 + $0x20] sm:$0xff] %vm127_vm1, %v115_v21  ;;  %v168_v23 = vpack.c.b16 %v148_v22, %v148_v22 }
  0x61   :  { %v169_v24 = vpack.c.b8 %v168_v23, %v168_v23  ;;  %v23_v23 = vld [vmem:[%s504_s0 + $0x50] sm:$0xff] }
  0x63   :  { %197 = vst.msk [vmem:[%s506_s3 + $0x8] sm:$0x3] %vm192_vm2, %v169_v24  ;;  %v22_v24 = vld [vmem:[%s504_s0 + $0x48] sm:$0xff] }
  0x64   :  { %v64_v26 = vpop.permute.xlu2 %63 }
  0x65   :  { %vm100_vm3 = vcmp.lt.s32.totalorder %v293_v18, %v64_v26 }
  0x66   :  { %v116_v27 = vsel %vm100_vm3, %v18_v25, 0  ;;  %v149_v28 = vsel %vm100_vm3, 1, %v221_v0 }
  0x67   :  { %133 = vst.msk [vmem:[%s505_s2 + $0x28] sm:$0xff] %vm127_vm1, %v116_v27  ;;  %v170_v29 = vpack.c.b16 %v149_v28, %v149_v28 }
  0x69   :  { %v171_v30 = vpack.c.b8 %v170_v29, %v170_v29 }
  0x6b   :  { %198 = vst.msk [vmem:[%s506_s3 + $0xa] sm:$0x3] %vm192_vm2, %v171_v30 }
  0x6c   :  { %v73_v32 = vpop.permute.xlu2 %72 }
  0x6d   :  { %vm103_vm4 = vcmp.lt.s32.totalorder %v293_v18, %v73_v32 }
  0x6e   :  { %v119_v33 = vsel %vm103_vm4, %v21_v31, 0  ;;  %v152_v34 = vsel %vm103_vm4, 1, %v221_v0 }
  0x6f   :  { %136 = vst.msk [vmem:[%s505_s2 + $0x40] sm:$0xff] %vm127_vm1, %v119_v33  ;;  %v176_v35 = vpack.c.b16 %v152_v34, %v152_v34 }
  0x71   :  { %v177_v36 = vpack.c.b8 %v176_v35, %v176_v35  ;;  %v26_v35 = vld [vmem:[%s504_s0 + $0x68] sm:$0xff] }
  0x73   :  { %201 = vst.msk [vmem:[%s506_s3 + $0x10] sm:$0x3] %vm192_vm2, %v177_v36  ;;  %v25_v36 = vld [vmem:[%s504_s0 + $0x60] sm:$0xff] }
  0x74   :  { %v82_v38 = vpop.permute.xlu2 %81 }
  0x75   :  { %vm106_vm5 = vcmp.lt.s32.totalorder %v293_v18, %v82_v38  ;;  %v55_v41 = vpop.permute.xlu1 %54  ;;  %v49_v42 = vpop.permute.xlu0 %48 }
  0x76   :  { %v122_v43 = vsel %vm106_vm5, %v24_v37, 0  ;;  %v155_v44 = vsel %vm106_vm5, 1, %v221_v0  ;;  %vm97_vm6 = vcmp.lt.s32.totalorder %v293_v18, %v55_v41  ;;  %vm95_vm7 = vcmp.lt.s32.totalorder %v293_v18, %v49_v42 }
  0x77   :  { %139 = vst.msk [vmem:[%s505_s2 + $0x58] sm:$0xff] %vm127_vm1, %v122_v43  ;;  %v182_v45 = vpack.c.b16 %v155_v44, %v155_v44  ;;  %v113_v46 = vsel %vm97_vm6, %v15_v39, 0  ;;  %v146_v47 = vsel %vm97_vm6, 1, %v221_v0  ;;  %v111_v48 = vsel %vm95_vm7, %v13_v40, 0 }
  0x78   :  { %130 = vst.msk [vmem:[%s505_s2 + $0x10] sm:$0xff] %vm127_vm1, %v113_v46  ;;  %v164_v49 = vpack.c.b16 %v146_v47, %v146_v47  ;;  %v144_v50 = vsel %vm95_vm7, 1, %v221_v0  ;;  %v28_v47 = vld [vmem:[%s504_s0 + $0x78] sm:$0xff] }
  0x79   :  { %v183_v51 = vpack.c.b8 %v182_v45, %v182_v45  ;;  %128 = vst.msk [vmem:[%s505_s2] sm:$0xff] %vm127_vm1, %v111_v48  ;;  %v160_v52 = vpack.c.b16 %v144_v50, %v144_v50 }
  0x7a   :  { %v165_v53 = vpack.c.b8 %v164_v49, %v164_v49 }
  0x7b   :  { %204 = vst.msk [vmem:[%s506_s3 + $0x16] sm:$0x3] %vm192_vm2, %v183_v51  ;;  %v161_v54 = vpack.c.b8 %v160_v52, %v160_v52 }
  0x7c   :  { %195 = vst.msk [vmem:[%s506_s3 + $0x4] sm:$0x3] %vm192_vm2, %v165_v53  ;;  %v91_v56 = vpop.permute.xlu2 %90 }
  0x7d   :  { %193 = vst.msk [vmem:[%s506_s3] sm:$0x3] %vm192_vm2, %v161_v54  ;;  %vm109_vm8 = vcmp.lt.s32.totalorder %v293_v18, %v91_v56  ;;  %v58_v59 = vpop.permute.xlu1 %57  ;;  %v52_v60 = vpop.permute.xlu0 %51 }
  0x7e   :  { %v125_v61 = vsel %vm109_vm8, %v27_v55, 0  ;;  %v158_v62 = vsel %vm109_vm8, 1, %v221_v0  ;;  %vm98_vm9 = vcmp.lt.s32.totalorder %v293_v18, %v58_v59  ;;  %vm96_vm10 = vcmp.lt.s32.totalorder %v293_v18, %v52_v60 }
  0x7f   :  { %142 = vst.msk [vmem:[%s505_s2 + $0x70] sm:$0xff] %vm127_vm1, %v125_v61  ;;  %v188_v63 = vpack.c.b16 %v158_v62, %v158_v62  ;;  %v114_v1 = vsel %vm98_vm9, %v16_v57, 0  ;;  %v147_v2 = vsel %vm98_vm9, 1, %v221_v0  ;;  %v112_v3 = vsel %vm96_vm10, %v14_v58, 0 }
  0x80   :  { %131 = vst.msk [vmem:[%s505_s2 + $0x18] sm:$0xff] %vm127_vm1, %v114_v1  ;;  %v166_v4 = vpack.c.b16 %v147_v2, %v147_v2  ;;  %v145_v5 = vsel %vm96_vm10, 1, %v221_v0 }
  0x81   :  { %v189_v6 = vpack.c.b8 %v188_v63, %v188_v63  ;;  %129 = vst.msk [vmem:[%s505_s2 + $0x8] sm:$0xff] %vm127_vm1, %v112_v3  ;;  %v162_v7 = vpack.c.b16 %v145_v5, %v145_v5 }
  0x82   :  { %v167_v8 = vpack.c.b8 %v166_v4, %v166_v4 }
  0x83   :  { %207 = vst.msk [vmem:[%s506_s3 + $0x1c] sm:$0x3] %vm192_vm2, %v189_v6  ;;  %v163_v9 = vpack.c.b8 %v162_v7, %v162_v7 }
  0x84   :  { %196 = vst.msk [vmem:[%s506_s3 + $0x6] sm:$0x3] %vm192_vm2, %v167_v8 }
  0x85   :  { %194 = vst.msk [vmem:[%s506_s3 + $0x2] sm:$0x3] %vm192_vm2, %v163_v9  ;;  %v70_v12 = vpop.permute.xlu1 %69  ;;  %v67_v13 = vpop.permute.xlu0 %66 }
  0x86   :  { %vm102_vm11 = vcmp.lt.s32.totalorder %v293_v18, %v70_v12  ;;  %vm101_vm12 = vcmp.lt.s32.totalorder %v293_v18, %v67_v13 }
  0x87   :  { %v118_v14 = vsel %vm102_vm11, %v20_v10, 0  ;;  %v151_v15 = vsel %vm102_vm11, 1, %v221_v0  ;;  %v117_v16 = vsel %vm101_vm12, %v19_v11, 0  ;;  %v150_v17 = vsel %vm101_vm12, 1, %v221_v0 }
  0x88   :  { %135 = vst.msk [vmem:[%s505_s2 + $0x38] sm:$0xff] %vm127_vm1, %v118_v14  ;;  %v174_v19 = vpack.c.b16 %v151_v15, %v151_v15  ;;  %v172_v20 = vpack.c.b16 %v150_v17, %v150_v17 }
  0x89   :  { %134 = vst.msk [vmem:[%s505_s2 + $0x30] sm:$0xff] %vm127_vm1, %v117_v16 }
  0x8a   :  { %v175_v21 = vpack.c.b8 %v174_v19, %v174_v19  ;;  %v173_v22 = vpack.c.b8 %v172_v20, %v172_v20 }
  0x8c   :  { %200 = vst.msk [vmem:[%s506_s3 + $0xe] sm:$0x3] %vm192_vm2, %v175_v21 }
  0x8d   :  { %199 = vst.msk [vmem:[%s506_s3 + $0xc] sm:$0x3] %vm192_vm2, %v173_v22  ;;  %v79_v25 = vpop.permute.xlu1 %78  ;;  %v76_v26 = vpop.permute.xlu0 %75 }
  0x8e   :  { %vm105_vm13 = vcmp.lt.s32.totalorder %v293_v18, %v79_v25  ;;  %vm104_vm14 = vcmp.lt.s32.totalorder %v293_v18, %v76_v26 }
  0x8f   :  { %v121_v27 = vsel %vm105_vm13, %v23_v23, 0  ;;  %v154_v28 = vsel %vm105_vm13, 1, %v221_v0  ;;  %v120_v29 = vsel %vm104_vm14, %v22_v24, 0  ;;  %v153_v30 = vsel %vm104_vm14, 1, %v221_v0 }
  0x90   :  { %138 = vst.msk [vmem:[%s505_s2 + $0x50] sm:$0xff] %vm127_vm1, %v121_v27  ;;  %v180_v31 = vpack.c.b16 %v154_v28, %v154_v28  ;;  %v178_v32 = vpack.c.b16 %v153_v30, %v153_v30 }
  0x91   :  { %137 = vst.msk [vmem:[%s505_s2 + $0x48] sm:$0xff] %vm127_vm1, %v120_v29 }
  0x92   :  { %v181_v33 = vpack.c.b8 %v180_v31, %v180_v31  ;;  %v179_v34 = vpack.c.b8 %v178_v32, %v178_v32 }
  0x94   :  { %203 = vst.msk [vmem:[%s506_s3 + $0x14] sm:$0x3] %vm192_vm2, %v181_v33 }
  0x95   :  { %202 = vst.msk [vmem:[%s506_s3 + $0x12] sm:$0x3] %vm192_vm2, %v179_v34  ;;  %v88_v37 = vpop.permute.xlu1 %87  ;;  %v85_v38 = vpop.permute.xlu0 %84 }
  0x96   :  { %vm108_vm15 = vcmp.lt.s32.totalorder %v293_v18, %v88_v37  ;;  %vm107_vm0 = vcmp.lt.s32.totalorder %v293_v18, %v85_v38 }
  0x97   :  { %v124_v39 = vsel %vm108_vm15, %v26_v35, 0  ;;  %v157_v40 = vsel %vm108_vm15, 1, %v221_v0  ;;  %v123_v41 = vsel %vm107_vm0, %v25_v36, 0  ;;  %v156_v42 = vsel %vm107_vm0, 1, %v221_v0 }
  0x98   :  { %141 = vst.msk [vmem:[%s505_s2 + $0x68] sm:$0xff] %vm127_vm1, %v124_v39  ;;  %v186_v43 = vpack.c.b16 %v157_v40, %v157_v40  ;;  %v184_v44 = vpack.c.b16 %v156_v42, %v156_v42 }
  0x99   :  { %140 = vst.msk [vmem:[%s505_s2 + $0x60] sm:$0xff] %vm127_vm1, %v123_v41 }
  0x9a   :  { %v187_v45 = vpack.c.b8 %v186_v43, %v186_v43  ;;  %v185_v46 = vpack.c.b8 %v184_v44, %v184_v44 }
  0x9c   :  { %206 = vst.msk [vmem:[%s506_s3 + $0x1a] sm:$0x3] %vm192_vm2, %v187_v45 }
  0x9d   :  { %205 = vst.msk [vmem:[%s506_s3 + $0x18] sm:$0x3] %vm192_vm2, %v185_v46  ;;  %v94_v48 = vpop.permute.xlu0 %93 }
  0x9e   :  { %vm110_vm3 = vcmp.lt.s32.totalorder %v293_v18, %v94_v48 }
  0x9f   :  { %v126_v49 = vsel %vm110_vm3, %v28_v47, 0  ;;  %v159_v50 = vsel %vm110_vm3, 1, %v221_v0 }
  0xa0   :  { %143 = vst.msk [vmem:[%s505_s2 + $0x78] sm:$0xff] %vm127_vm1, %v126_v49  ;;  %v190_v51 = vpack.c.b16 %v159_v50, %v159_v50 }
  0xa2   :  { %v191_v52 = vpack.c.b8 %v190_v51, %v190_v51 }
  0xa4   :  { %208 = vst.msk [vmem:[%s506_s3 + $0x1e] sm:$0x3] %vm192_vm2, %v191_v52 }

</bundles_post_ra>
